<compile_context>
chip_gen: v5e
topology: v5e:2x2
jax: 0.10.0
libtpu: 0.0.40
codegen_flags: <defaults>
</compile_context>

<pallas_src>
import functools

import jax
import jax.numpy as jnp
from jax.experimental import pallas as pl
from jax.experimental.pallas import tpu as pltpu


def conv_block_kernel(x_ref, w_ref, shift_ref, pmat_ref, out_ref, *, K):
    """One grid step = BB batch elements packed along the lane axis.

    x_ref:     (C_pad, BB*L)      packed input tile (bf16, channel-padded)
    w_ref:     (C_out, K*C_pad)   im2col conv weight, BN scale & 1/pool_dim folded in
    shift_ref: (C_out, 1)         folded BN shift / pool_dim (f32)
    pmat_ref:  (W, BB*Lpool)      block-diagonal 0/1 pooling matrix (bf16), W = BB*L-K+1
    out_ref:   (C_out, BB*Lpool)  pooled output (f32)
    """
    x = x_ref[...]
    Lw = x.shape[-1]
    W = Lw - (K - 1)

    # im2col in registers: stack[k*C_pad + ci, p] = x[ci, p + k].
    # Lane-offset slices + sublane concatenation (each block is whole packed sublane
    # groups thanks to the host-side channel padding).  The conv-output columns that
    # straddle packed-batch boundaries hold finite x data and are zeroed exactly by
    # the 0/1 pooling matrix, so no masking / scratch zeroing is needed.
    stack = jnp.concatenate([x[:, k:k + W] for k in range(K)], axis=0)  # (K*C_pad, W)

    # Conv1d + folded BN scale (+ 1/pool_dim) as a single bf16 MXU matmul, f32 acc.
    acc = jnp.dot(w_ref[...], stack, preferred_element_type=jnp.float32)  # (C_out, W)

    # BN shift + ReLU in f32 on the VPU (v5e has no bf16 VPU).
    y = jnp.maximum(acc + shift_ref[...], 0.0)
    # TODO(synk): nn.Dropout(p=0.2) is identity in eval mode; training-mode RNG mask
    # (pltpu.prng_seed / prng_random_bits) not implemented.

    # AvgPool1d as a second bf16 MXU matmul against the resident 0/1 pooling matrix
    # (1/pool_dim already folded into the weight/shift).
    out_ref[...] = jnp.dot(y.astype(pmat_ref.dtype), pmat_ref[...],
                           preferred_element_type=jnp.float32).astype(out_ref.dtype)


def _round_up(x, m):
    return (x + m - 1) // m * m


def _pick_batch_pack(B, L, Lpool, C_pad, C_out, K, vmem_budget=8 * 1024 * 1024):
    """Largest BB dividing B whose per-step footprint fits the VMEM budget.

    The budget (8 MiB) stays well inside the scoped default on v5e/v6e/v7x.
    TODO(synk): on v7x megacore, additionally prefer nb = B//BB to be a multiple of 2
    so the parallel grid axis splits evenly across the two TensorCores.
    """
    best = 1
    for bb in range(1, B + 1):
        if B % bb:
            continue
        Lw = bb * L
        W = Lw - (K - 1)
        cols = bb * Lpool
        est = (2 * C_pad * Lw * 2            # x tile, double-buffered, bf16
               + C_out * K * C_pad * 2       # resident im2col weight (bf16)
               + C_out * 4                   # shift
               + W * cols * 2                # resident pooling matrix (bf16, ~BB^2)
               + 2 * C_out * cols * 4        # out tile, double-buffered, f32
               + K * C_pad * W * 2           # im2col stack (registers / spill)
               + 2 * C_out * W * 4)          # acc / relu temporaries (f32)
        if est <= vmem_budget:
            best = bb
    return best


def conv_block_forward(x, w_grouped, conv_bias, gamma, beta, running_mean,
                       running_var, *, groups, pool_dim, eps=1e-3):
    """x: (B, C_in, L) float32.  w_grouped: (C_out, C_in // groups, K)."""
    B, C_in, L = x.shape
    C_out, cin_g, K = w_grouped.shape
    Lout = L - K + 1
    Lpool = (Lout - pool_dim) // pool_dim + 1
    cout_g = C_out // groups

    compute_dtype = jnp.bfloat16
    C_pad = _round_up(C_in, 16)   # bf16 sublane packing -> aligned k-blocks, even/odd C_in

    # --- host-side glue (plain JAX) -----------------------------------------------
    # Densify the grouped weight (tiny per-group channel counts pad to 8x128 anyway).
    # TODO(synk): for production shapes with per-group channels >= ~128, add a group
    # axis to the grid instead of multiplying by a block-diagonal dense weight.
    w_dense = jnp.zeros((C_out, C_in, K), jnp.float32)
    for g in range(groups):
        w_dense = w_dense.at[g * cout_g:(g + 1) * cout_g,
                             g * cin_g:(g + 1) * cin_g, :].set(
            w_grouped[g * cout_g:(g + 1) * cout_g].astype(jnp.float32))

    # Fold BatchNorm (inference) AND the 1/pool_dim average into the conv:
    #   relu((scale/pd)*conv + shift/pd) == relu(scale*conv + shift) / pd   (pd > 0)
    inv_std = 1.0 / jnp.sqrt(running_var.astype(jnp.float32) + eps)
    scale = gamma.astype(jnp.float32) * inv_std                               # (C_out,)
    shift = (((conv_bias.astype(jnp.float32) - running_mean.astype(jnp.float32)) * scale
              + beta.astype(jnp.float32)) / pool_dim).reshape(C_out, 1)

    # im2col weight layout: w2[o, k*C_pad + ci] = (scale[o]/pool_dim) * w[o, ci, k]
    w_scaled = w_dense * (scale / pool_dim)[:, None, None]                    # (C_out, C_in, K)
    w2 = jnp.zeros((C_out, K, C_pad), jnp.float32)
    w2 = w2.at[:, :, :C_in].set(w_scaled.transpose(0, 2, 1))                  # (C_out, K, C_pad)
    w2 = w2.reshape(C_out, K * C_pad).astype(compute_dtype)

    # Pack BB batch elements onto the lane axis of every grid step (lane-dense tiles).
    BB = _pick_batch_pack(B, L, Lpool, C_pad, C_out, K)
    nb = B // BB
    Lw = BB * L
    W = Lw - (K - 1)
    cols = BB * Lpool

    x_p = jnp.pad(x.astype(jnp.float32), ((0, 0), (0, C_pad - C_in), (0, 0)))
    x_packed = (x_p.astype(compute_dtype)
                .reshape(nb, BB, C_pad, L)
                .transpose(0, 2, 1, 3)
                .reshape(nb, C_pad, Lw))

    # Grid-invariant block-diagonal 0/1 pooling matrix: pooled column c averages conv
    # positions start..start+pool_dim-1 with start = (c//Lpool)*L + (c%Lpool)*pool_dim.
    r = jnp.arange(W, dtype=jnp.int32)[:, None]
    c = jnp.arange(cols, dtype=jnp.int32)[None, :]
    start = (c // Lpool) * L + (c % Lpool) * pool_dim
    pmat = ((r >= start) & (r < start + pool_dim)).astype(compute_dtype)

    kernel = functools.partial(conv_block_kernel, K=K)

    cost = pl.CostEstimate(
        flops=nb * (2 * C_out * (K * C_pad) * W + 2 * C_out * W * cols),
        transcendentals=0,
        bytes_accessed=(x_packed.size * x_packed.dtype.itemsize
                        + w2.size * w2.dtype.itemsize
                        + shift.size * shift.dtype.itemsize
                        + pmat.size * pmat.dtype.itemsize
                        + nb * C_out * cols * 4))

    grid_spec = pltpu.PrefetchScalarGridSpec(
        num_scalar_prefetch=0,
        grid=(nb,),
        in_specs=[
            pl.BlockSpec((None, C_pad, Lw), lambda i: (i, 0, 0)),     # packed x
            pl.BlockSpec((C_out, K * C_pad), lambda i: (0, 0)),       # im2col weight
            pl.BlockSpec((C_out, 1), lambda i: (0, 0)),               # folded BN shift
            pl.BlockSpec((W, cols), lambda i: (0, 0)),                # pooling matrix
        ],
        out_specs=pl.BlockSpec((None, C_out, cols), lambda i: (i, 0, 0)),
    )

    # TODO(synk): output could be emitted in bf16 if the downstream consumer accepts it
    # (halves writeback); kept f32 to match the PyTorch module's dtype.
    out_packed = pl.pallas_call(
        kernel,
        out_shape=jax.ShapeDtypeStruct((nb, C_out, cols), jnp.float32),
        grid_spec=grid_spec,
        compiler_params=pltpu.CompilerParams(
            dimension_semantics=("parallel",),
            vmem_limit_bytes=32 * 1024 * 1024),
        cost_estimate=cost,
    )(x_packed, w2, shift, pmat)

    # Unpack the lane-packed batches back to PyTorch NCL layout.
    out = (out_packed.reshape(nb, C_out, BB, Lpool)
           .transpose(0, 2, 1, 3)
           .reshape(B, C_out, Lpool))
    return out


def conv_block_reference(x, w_grouped, conv_bias, gamma, beta, running_mean,
                         running_var, *, groups, pool_dim, eps=1e-3):
    """Plain-JAX reference mirroring the PyTorch module (eval mode)."""
    conv = jax.lax.conv_general_dilated(
        x, w_grouped, window_strides=(1,), padding="VALID",
        dimension_numbers=("NCH", "OIH", "NCH"),
        feature_group_count=groups,
    ) + conv_bias[None, :, None]
    bn = (gamma[None, :, None] * (conv - running_mean[None, :, None])
          / jnp.sqrt(running_var[None, :, None] + eps) + beta[None, :, None])
    act = jnp.maximum(bn, 0.0)
    B, C, Lout = act.shape
    Lpool = (Lout - pool_dim) // pool_dim + 1
    pooled = act[:, :, :Lpool * pool_dim].reshape(B, C, Lpool, pool_dim).mean(-1)
    return pooled


if __name__ == "__main__":
    # Small shapes consistent with the module: (batch, in_channels, L)
    B, C_in, L = 2, 4, 16
    C_out, K = 8, 5
    groups, pool_dim = 2, 2
    eps = 1e-3  # module default eps=0.001

    key = jax.random.PRNGKey(0)
    kx, kw, kb, kg, kbt, km, kv = jax.random.split(key, 7)

    x = jax.random.normal(kx, (B, C_in, L), jnp.float32)
    # Conv1d weight shape (out_channels, in_channels // groups, kernel_size)
    w_grouped = jax.random.normal(kw, (C_out, C_in // groups, K), jnp.float32) * 0.2
    conv_bias = jax.random.normal(kb, (C_out,), jnp.float32) * 0.1
    # BatchNorm parameters / running statistics (deterministic, non-trivial)
    gamma = 1.0 + 0.1 * jax.random.normal(kg, (C_out,), jnp.float32)
    beta = 0.1 * jax.random.normal(kbt, (C_out,), jnp.float32)
    running_mean = 0.1 * jax.random.normal(km, (C_out,), jnp.float32)
    running_var = jax.random.uniform(kv, (C_out,), jnp.float32, 0.5, 1.5)

    out = conv_block_forward(
        x, w_grouped, conv_bias, gamma, beta, running_mean, running_var,
        groups=groups, pool_dim=pool_dim, eps=eps)
    out = jax.block_until_ready(out)

    ref = conv_block_reference(
        x, w_grouped, conv_bias, gamma, beta, running_mean, running_var,
        groups=groups, pool_dim=pool_dim, eps=eps)

    Lpool = (L - K + 1 - pool_dim) // pool_dim + 1
    if out.shape != (B, C_out, Lpool):
        raise AssertionError(f"bad output shape {out.shape}")
    # bf16 MXU operands (x, w, relu output, pool matrix) with f32 accumulation ->
    # tolerance loosened vs a pure-f32 check.
    if not jnp.allclose(out, ref, atol=5e-2, rtol=5e-2):
        raise AssertionError("Pallas kernel does not match reference")

    print("KERNEL_OK")
</pallas_src>

<mosaic_0001>
module attributes {stable_mosaic.version = 11 : i64} {
  func.func @conv_block_kernel(%arg0: i32, %arg1: memref<1x16x32xbf16, #tpu.memory_space<vmem>>, %arg2: memref<8x80xbf16, #tpu.memory_space<vmem>>, %arg3: memref<8x1xf32, #tpu.memory_space<vmem>>, %arg4: memref<28x12xbf16, #tpu.memory_space<vmem>>, %arg5: memref<1x8x12xf32, #tpu.memory_space<vmem>>) attributes {dimension_semantics = [#tpu.dimension_semantics<parallel>], iteration_bounds = array<i64: 1>, scalar_prefetch = 0 : i64, scratch_operands = 0 : i64, tpu.core_type = #tpu.core_type<tc>, window_params = [{transform_indices = @transform_0, window_bounds = array<i64: 1, 16, 32>}, {pipeline_mode = #tpu.pipeline_mode<synchronous>, transform_indices = @transform_1, window_bounds = array<i64: 8, 80>}, {pipeline_mode = #tpu.pipeline_mode<synchronous>, transform_indices = @transform_2, window_bounds = array<i64: 8, 1>}, {pipeline_mode = #tpu.pipeline_mode<synchronous>, transform_indices = @transform_3, window_bounds = array<i64: 28, 12>}, {transform_indices = @transform_4, window_bounds = array<i64: 1, 8, 12>}]} {
    %c0 = arith.constant 0 : index
    %c0_0 = arith.constant 0 : index
    %c0_1 = arith.constant 0 : index
    %0 = vector.load %arg1[%c0, %c0_0, %c0_1] : memref<1x16x32xbf16, #tpu.memory_space<vmem>>, vector<1x16x32xbf16>
    %1 = vector.shape_cast %0 : vector<1x16x32xbf16> to vector<16x32xbf16>
    %2 = vector.extract_strided_slice %1 {offsets = [0, 0], sizes = [16, 28], strides = [1, 1]} : vector<16x32xbf16> to vector<16x28xbf16>
    %3 = vector.extract_strided_slice %1 {offsets = [0, 1], sizes = [16, 28], strides = [1, 1]} : vector<16x32xbf16> to vector<16x28xbf16>
    %4 = vector.extract_strided_slice %1 {offsets = [0, 2], sizes = [16, 28], strides = [1, 1]} : vector<16x32xbf16> to vector<16x28xbf16>
    %5 = vector.extract_strided_slice %1 {offsets = [0, 3], sizes = [16, 28], strides = [1, 1]} : vector<16x32xbf16> to vector<16x28xbf16>
    %6 = vector.extract_strided_slice %1 {offsets = [0, 4], sizes = [16, 28], strides = [1, 1]} : vector<16x32xbf16> to vector<16x28xbf16>
    %7 = tpu.concatenate %2, %3, %4, %5, %6 in 0 : vector<16x28xbf16>, vector<16x28xbf16>, vector<16x28xbf16>, vector<16x28xbf16>, vector<16x28xbf16> -> vector<80x28xbf16>
    %c0_2 = arith.constant 0 : index
    %c0_3 = arith.constant 0 : index
    %8 = vector.load %arg2[%c0_2, %c0_3] : memref<8x80xbf16, #tpu.memory_space<vmem>>, vector<8x80xbf16>
    %cst = arith.constant dense<0.000000e+00> : vector<8x28xf32>
    %9 = tpu.matmul %8, %7, %cst {dimension_numbers = #tpu.dot_dimension_numbers<[1], [0], [0], [1], [0, 0, 1, 1], [], []>} : vector<8x80xbf16>, vector<80x28xbf16>, vector<8x28xf32> -> vector<8x28xf32>
    %c0_4 = arith.constant 0 : index
    %c0_5 = arith.constant 0 : index
    %10 = vector.load %arg3[%c0_4, %c0_5] : memref<8x1xf32, #tpu.memory_space<vmem>>, vector<8x1xf32>
    %11 = vector.broadcast %10 : vector<8x1xf32> to vector<8x28xf32>
    %12 = arith.addf %9, %11 : vector<8x28xf32>
    %cst_6 = arith.constant 0.000000e+00 : f32
    %13 = vector.broadcast %cst_6 : f32 to vector<8x28xf32>
    %14 = arith.maximumf %12, %13 : vector<8x28xf32>
    %15 = arith.truncf %14 : vector<8x28xf32> to vector<8x28xbf16>
    %c0_7 = arith.constant 0 : index
    %c0_8 = arith.constant 0 : index
    %16 = vector.load %arg4[%c0_7, %c0_8] : memref<28x12xbf16, #tpu.memory_space<vmem>>, vector<28x12xbf16>
    %cst_9 = arith.constant dense<0.000000e+00> : vector<8x12xf32>
    %17 = tpu.matmul %15, %16, %cst_9 {dimension_numbers = #tpu.dot_dimension_numbers<[1], [0], [0], [1], [0, 0, 1, 1], [], []>} : vector<8x28xbf16>, vector<28x12xbf16>, vector<8x12xf32> -> vector<8x12xf32>
    %c0_10 = arith.constant 0 : index
    %c0_11 = arith.constant 0 : index
    %c0_12 = arith.constant 0 : index
    %18 = vector.load %arg5[%c0_10, %c0_11, %c0_12] : memref<1x8x12xf32, #tpu.memory_space<vmem>>, vector<1x8x12xf32>
    %19 = vector.shape_cast %18 : vector<1x8x12xf32> to vector<8x12xf32>
    %20 = vector.shape_cast %17 : vector<8x12xf32> to vector<1x8x12xf32>
    tpu.vector_store %arg5[%c0_10, %c0_11, %c0_12], %20 {strides = array<i32>} : memref<1x8x12xf32, #tpu.memory_space<vmem>>, vector<1x8x12xf32>,
    return
  }
  func.func @transform_0(%arg0: i32) -> (i32, i32, i32) {
    %c0_i32 = arith.constant 0 : i32
    %c0_i32_0 = arith.constant 0 : i32
    %c0_i32_1 = arith.constant 0 : i32
    return %arg0, %c0_i32, %c0_i32_0 : i32, i32, i32
  }
  func.func @transform_1(%arg0: i32) -> (i32, i32) {
    %c0_i32 = arith.constant 0 : i32
    %c0_i32_0 = arith.constant 0 : i32
    %c0_i32_1 = arith.constant 0 : i32
    return %c0_i32, %c0_i32_0 : i32, i32
  }
  func.func @transform_2(%arg0: i32) -> (i32, i32) {
    %c0_i32 = arith.constant 0 : i32
    %c0_i32_0 = arith.constant 0 : i32
    %c0_i32_1 = arith.constant 0 : i32
    return %c0_i32, %c0_i32_0 : i32, i32
  }
  func.func @transform_3(%arg0: i32) -> (i32, i32) {
    %c0_i32 = arith.constant 0 : i32
    %c0_i32_0 = arith.constant 0 : i32
    %c0_i32_1 = arith.constant 0 : i32
    return %c0_i32, %c0_i32_0 : i32, i32
  }
  func.func @transform_4(%arg0: i32) -> (i32, i32, i32) {
    %c0_i32 = arith.constant 0 : i32
    %c0_i32_0 = arith.constant 0 : i32
    %c0_i32_1 = arith.constant 0 : i32
    return %arg0, %c0_i32, %c0_i32_0 : i32, i32, i32
  }
}

</mosaic_0001>

<bundles_post_ra>
// kernel: tpu_custom_call.1
= control target key start
LH: loop header
LB: loop body
LE: loop exit
PB: predicated region body
PF: predicated region fallthrough
CT: control target
= control target key end

     0   :  { %s222_s0 = inlined_call_operand.vmem [shape: bf16[1,16,32], index: 0, kind: input, shape index: {}]   ;;  %s223_s1 = inlined_call_operand.vmem [shape: bf16[8,80], index: 1, kind: input, shape index: {}]   ;;  %s224_s2 = inlined_call_operand.vmem [shape: f32[8,1], index: 2, kind: input, shape index: {}]   ;;  %s225_s3 = inlined_call_operand.vmem [shape: bf16[28,12], index: 3, kind: input, shape index: {}]   ;;  %s226_s4 = inlined_call_operand.hbm [shape: f32[1,8,12], index: 4, kind: output, shape index: {}]  }
   0x1   :  { %v133_v0 = vld [vmem:[%s222_s0] sm:$0xff] }
   0x2   :  { %9 = vsyncpa [#allocation3], 0  ;;  %s170_s17 = smov 124   ;;  %s171_s18 = smov 126   ;;  %v40_v1 = vld [vmem:[%s224_s2] sm:$0xff]  ;;  %v174_v4 = vmov 0  }
   0x3   :  { %36 = vrot.lane.b32.xlu0 %v133_v0, %s170_s17  ;;  %30 = vrot.lane.b32.xlu1 %v133_v0, %s171_s18  ;;  %s172_s19 = smov 125   ;;  %s173_s20 = smov 127   ;;  %v130_v2 = vld [vmem:[%s225_s3 + $0x8] sm:$0xf]  ;;  %v135_v3 = vld [vmem:[%s225_s3 + $0x8] sm:$0x30] }
   0x4   :  { %142 = vset.pattern.permute.xlu2 %v174_v4  ;;  %v131_v5 = vor.u32 %v135_v3, %v130_v2  ;;  %vm84_vm0 = vcmask 1045504   ;;  %143 = vset.pattern.permute.xlu0 %v174_v4  ;;  %v39_v11 = vld [vmem:[%s223_s1] sm:$0xf]  ;;  %vm46_vm1 = vcmask 654336   ;;  %vm80_vm2 = vcmask 228352   ;;  %s175_s29 = smov [#allocation2]  }
   0x5   :  { %43 = vperm.xlu2 %142, %v40_v1   ;;  %v134_v12 = vld [vmem:[%s225_s3] sm:$0xff]  ;;  %s108_s30 = sshll.u32 %s175_s29, 4  ;;  %s110_s1 = sshll.u32 %s226_s4, 4  ;;  %vm101_vm3 = vcmask 97280   ;;  %s109_s30 = int_to_ptr.vmem [resolvable:$true] %s108_s30  ;;  %s111_s1 = int_to_ptr.hbm [resolvable:$true] %s110_s1 }
   0x6   :  { %v86_v6 = vsel %vm84_vm0, %v131_v5, 0 }
   0x7   :  { %94 = vmatpush.bf16.msra.mxu1 %v86_v6 }
   0xb   :  { %33 = vrot.lane.b32.xlu0 %v133_v0, %s172_s19  ;;  %27 = vrot.lane.b32.xlu1 %v133_v0, %s173_s20 }
   0xc   :  { %95 = vmatpush.bf16.msra.mxu1 %v134_v12 }
  0x5f   :  { %v44_v13 = vpop.permute.xlu2 %43 }
  0x75   :  { %v37_v7 = vpop.permute.xlu0 %36  ;;  %v31_v8 = vpop.permute.xlu1 %30 }
  0x76   :  { %53 = vmatpush.bf16.msra.mxu0 %v37_v7 }
  0x7d   :  { %v34_v9 = vpop.permute.xlu0 %33  ;;  %v28_v10 = vpop.permute.xlu1 %27 }
  0x7e   :  { %54 = vmatpush.bf16.msra.mxu0 %v34_v9 }
  0x82   :  { %55 = vmatpush.bf16.msra.mxu0 %v31_v8 }
  0x86   :  { %56 = vmatpush.bf16.msra.mxu0 %v28_v10 }
  0x8a   :  { %57 = vmatpush.bf16.msra.mxu0 %v133_v0 }
  0x8d   :  { %123 = vmatmul.msk.bf16.vlgmr.msra.gmra.mxu0 %vm46_vm1, %v39_v11 }
 0x10a   :  { %v59_v14 = vpop.f32.mrf.mxu0 }
 0x10b   :  { %v60_v15 = vadd.f32 %v59_v14, %v44_v13 }
 0x10d   :  { %v63_v16 = vmax.f32 %v60_v15, 0.0 }
 0x10f   :  { %v64_v17 = vpack.c.bf16 %v63_v16, %v63_v16 }
 0x111   :  { %132 = vmatmul.msk.bf16.vlgmr.msra.gmra.mxu1 %vm80_vm2, %v64_v17 }
 0x112   :  { %v61_v18 = vpop.f32.mrf.mxu0 }
 0x18e   :  { %v97_v19 = vpop.f32.mrf.mxu1 }
 0x18f   :  { %102 = vst.msk [vmem:[#allocation2] sm:$0xff] %vm101_vm3, %v97_v19 }
 0x190   :  { %113 = dma.vmem_to_hbm [thread:$0]  %s109_s30, 128, %s111_s1, [#allocation3]  }
 0x196   :  { %v99_v20 = vpop.f32.mrf.mxu1 }
 0x197   :  { %168 = dma.done.wait [#allocation3], 128  }
 0x198   :  { %169 = vsyncadd [#allocation3], 4294967168 }
 0x199   :  { %118 = vsyncpa [#allocation3], 1 }

</bundles_post_ra>
